<compile_context>
chip_gen: v7x
topology: tpu7x:2x2x1
jax: 0.10.0
libtpu: 0.0.40
codegen_flags: <defaults>
</compile_context>

<pallas_src>
import jax
import jax.numpy as jnp
from jax.experimental import pallas as pl
from jax.experimental.pallas import tpu as pltpu


def _round_up(a, b):
    return ((a + b - 1) // b) * b


def _fused_softmax_matmul_kernel(w_ref, m_ref, inv_ref, x_ref, o_ref):
    # w_ref:   (tv, T) raw weight rows
    # m_ref:   (1, T)  per-column max of w         (f32)
    # inv_ref: (1, T)  per-column 1/sum(exp(w-m))  (f32)
    # x_ref:   (T, tn) input columns
    # o_ref:   (tv, tn) output tile
    p = jnp.exp(w_ref[...].astype(jnp.float32) - m_ref[...]) * inv_ref[...]
    o_ref[...] = jnp.dot(
        p, x_ref[...].astype(jnp.float32), preferred_element_type=jnp.float32
    ).astype(o_ref.dtype)


def conv1d_softmax(w, x, *, max_tile_v=512, max_tile_n=1024):
    """w: (V, T); x: (..., N) with prod(leading dims) == T.  Returns (V, N)."""
    V, T = w.shape
    x2 = x.reshape(-1, x.shape[-1])           # mirrors x.view(-1, x.size(-1))
    assert x2.shape[0] == T, "flattened leading dims must equal topic_size"
    N = x2.shape[1]
    out_dtype = jnp.promote_types(w.dtype, x2.dtype)

    # ---- tiny per-column softmax statistics (one streaming read of w) ----
    w32 = w.astype(jnp.float32)
    col_max = jnp.max(w32, axis=0, keepdims=True)                     # (1, T)
    col_inv = 1.0 / jnp.sum(jnp.exp(w32 - col_max), axis=0, keepdims=True)

    # ---- generation-aware VMEM budget ----
    try:
        vmem_total = int(pltpu.get_tpu_info().vmem_capacity_bytes)
    except Exception:
        vmem_total = 64 * 1024 * 1024
    if vmem_total <= 64 * 1024 * 1024:        # v7x-class: 64 MiB per core
        budget = 20 * 1024 * 1024
        vmem_limit = None                     # stay under 32 MiB scoped default
    else:                                     # v5e / v6e: 128 MiB
        budget = 48 * 1024 * 1024
        vmem_limit = 80 * 1024 * 1024

    wib = jnp.dtype(w.dtype).itemsize
    xib = jnp.dtype(x2.dtype).itemsize
    oib = jnp.dtype(out_dtype).itemsize

    def step_bytes(tv_, tn_):
        # Double-buffered, lane/sublane-padded VMEM footprint per grid step.
        w_tile = _round_up(tv_, 8) * _round_up(T, 128) * wib
        x_tile = _round_up(T, 8) * _round_up(tn_, 128) * xib
        o_tile = _round_up(tv_, 8) * _round_up(tn_, 128) * oib
        stats = 2 * _round_up(T, 128) * 4
        return 2 * (w_tile + x_tile + o_tile) + stats

    # ---- tile selection ----
    tv = V if V <= max_tile_v else max_tile_v      # multiple of 32, or == V

    # Prefer holding the whole flattened x resident (DMA'd exactly once).
    x_resident = step_bytes(tv, N) <= budget
    if x_resident:
        tn = N
    else:
        tn = min(max_tile_n, _round_up(N, 128))    # lane-aligned
        while step_bytes(tv, tn) > budget and tn > 128:
            tn = max(128, ((tn // 2) // 128) * 128)
        while step_bytes(tv, tn) > budget and tv > 32:
            tv = max(32, ((tv // 2) // 32) * 32)
        # TODO(synk): for very large T add a third ("arbitrary") grid axis over
        # T with an f32 VMEM accumulator instead of shrinking tv/tn further.

    num_v = pl.cdiv(V, tv)
    num_n = pl.cdiv(N, tn)

    # v7x megacore: make sure the parallel grid has >= 2 steps when possible.
    if num_v * num_n < 2 and V >= 64:
        tv = max(32, _round_up(pl.cdiv(V, 2), 32))
        num_v = pl.cdiv(V, tv)

    # Grid ordering: the operand whose block index follows the *inner* axis is
    # re-fetched once per outer step, so put the smaller operand there.
    x_inner = x_resident or (T * N * xib) <= (V * T * wib)
    if x_inner:
        grid = (num_v, num_n)
        w_map = lambda i, j: (i, 0)
        x_map = lambda i, j: (0, j)
        o_map = lambda i, j: (i, j)
    else:
        grid = (num_n, num_v)
        w_map = lambda j, i: (i, 0)
        x_map = lambda j, i: (0, j)
        o_map = lambda j, i: (i, j)
    stat_map = lambda a, b: (0, 0)

    # Advisory: tiny contraction dim (T) -> HBM-bandwidth-bound by construction.
    cost = pl.CostEstimate(
        flops=2 * V * T * N,
        transcendentals=V * T * num_n,        # exp recomputed per column tile
        bytes_accessed=int(V * T * wib + T * N * xib + V * N * oib),
    )

    compiler_kwargs = dict(dimension_semantics=("parallel", "parallel"))
    if vmem_limit is not None:
        compiler_kwargs["vmem_limit_bytes"] = vmem_limit

    out = pl.pallas_call(
        _fused_softmax_matmul_kernel,
        out_shape=jax.ShapeDtypeStruct((V, N), out_dtype),
        grid_spec=pltpu.PrefetchScalarGridSpec(
            num_scalar_prefetch=0,
            grid=grid,
            in_specs=[
                pl.BlockSpec((tv, T), w_map),      # weight row tile
                pl.BlockSpec((1, T), stat_map),    # per-column max
                pl.BlockSpec((1, T), stat_map),    # per-column 1/sum
                pl.BlockSpec((T, tn), x_map),      # input column tile
            ],
            out_specs=pl.BlockSpec((tv, tn), o_map),
        ),
        compiler_params=pltpu.CompilerParams(**compiler_kwargs),
        cost_estimate=cost,
    )(w, col_max, col_inv, x2)
    return out


if __name__ == "__main__":
    voc_size, topic_size = 32, 8

    key = jax.random.PRNGKey(0)
    k_w, k_x = jax.random.split(key)

    # Deterministic parameter init: nn.init.normal_(w, std=0.02)
    w = 0.02 * jax.random.normal(k_w, (voc_size, topic_size), dtype=jnp.float32)

    # Example input: leading dims flatten to topic_size (2 * 4 == 8), last dim 16
    x = jax.random.normal(k_x, (2, 4, 16), dtype=jnp.float32)

    out = conv1d_softmax(w, x)
    out = jax.block_until_ready(out)

    # Reference check in plain JAX (same math as the PyTorch forward)
    ref = jnp.dot(jax.nn.softmax(w, axis=0), x.reshape(-1, x.shape[-1]))
    assert out.shape == (voc_size, x.shape[-1])
    assert jnp.allclose(out, ref, atol=1e-5, rtol=1e-5), "mismatch vs reference"

    print("KERNEL_OK")
</pallas_src>

<mosaic_0001>
module attributes {stable_mosaic.version = 11 : i64} {
  func.func @_fused_softmax_matmul_kernel(%arg0: i32, %arg1: i32, %arg2: memref<32x8xf32, #tpu.memory_space<vmem>>, %arg3: memref<1x8xf32, #tpu.memory_space<vmem>>, %arg4: memref<1x8xf32, #tpu.memory_space<vmem>>, %arg5: memref<8x16xf32, #tpu.memory_space<vmem>>, %arg6: memref<32x16xf32, #tpu.memory_space<vmem>>) attributes {dimension_semantics = [#tpu.dimension_semantics<parallel>, #tpu.dimension_semantics<parallel>], iteration_bounds = array<i64: 1, 1>, scalar_prefetch = 0 : i64, scratch_operands = 0 : i64, tpu.core_type = #tpu.core_type<tc>, window_params = [{transform_indices = @transform_0, window_bounds = array<i64: 32, 8>}, {pipeline_mode = #tpu.pipeline_mode<synchronous>, transform_indices = @transform_1, window_bounds = array<i64: 1, 8>}, {pipeline_mode = #tpu.pipeline_mode<synchronous>, transform_indices = @transform_2, window_bounds = array<i64: 1, 8>}, {transform_indices = @transform_3, window_bounds = array<i64: 8, 16>}, {transform_indices = @transform_4, window_bounds = array<i64: 32, 16>}]} {
    %c0 = arith.constant 0 : index
    %c0_0 = arith.constant 0 : index
    %0 = vector.load %arg2[%c0, %c0_0] : memref<32x8xf32, #tpu.memory_space<vmem>>, vector<32x8xf32>
    %c0_1 = arith.constant 0 : index
    %c0_2 = arith.constant 0 : index
    %1 = vector.load %arg3[%c0_1, %c0_2] : memref<1x8xf32, #tpu.memory_space<vmem>>, vector<1x8xf32>
    %2 = vector.broadcast %1 : vector<1x8xf32> to vector<32x8xf32>
    %3 = arith.subf %0, %2 : vector<32x8xf32>
    %4 = math.exp %3 : vector<32x8xf32>
    %c0_3 = arith.constant 0 : index
    %c0_4 = arith.constant 0 : index
    %5 = vector.load %arg4[%c0_3, %c0_4] : memref<1x8xf32, #tpu.memory_space<vmem>>, vector<1x8xf32>
    %6 = vector.broadcast %5 : vector<1x8xf32> to vector<32x8xf32>
    %7 = arith.mulf %4, %6 : vector<32x8xf32>
    %c0_5 = arith.constant 0 : index
    %c0_6 = arith.constant 0 : index
    %8 = vector.load %arg5[%c0_5, %c0_6] : memref<8x16xf32, #tpu.memory_space<vmem>>, vector<8x16xf32>
    %cst = arith.constant dense<0.000000e+00> : vector<32x16xf32>
    %9 = tpu.matmul %7, %8, %cst {dimension_numbers = #tpu.dot_dimension_numbers<[1], [0], [0], [1], [0, 0, 1, 1], [], []>} : vector<32x8xf32>, vector<8x16xf32>, vector<32x16xf32> -> vector<32x16xf32>
    %c0_7 = arith.constant 0 : index
    %c0_8 = arith.constant 0 : index
    %10 = vector.load %arg6[%c0_7, %c0_8] : memref<32x16xf32, #tpu.memory_space<vmem>>, vector<32x16xf32>
    tpu.vector_store %arg6[%c0_7, %c0_8], %9 {strides = array<i32>} : memref<32x16xf32, #tpu.memory_space<vmem>>, vector<32x16xf32>,
    return
  }
  func.func @transform_0(%arg0: i32, %arg1: i32) -> (i32, i32) {
    %c0_i32 = arith.constant 0 : i32
    %c0_i32_0 = arith.constant 0 : i32
    return %arg0, %c0_i32 : i32, i32
  }
  func.func @transform_1(%arg0: i32, %arg1: i32) -> (i32, i32) {
    %c0_i32 = arith.constant 0 : i32
    %c0_i32_0 = arith.constant 0 : i32
    %c0_i32_1 = arith.constant 0 : i32
    return %c0_i32, %c0_i32_0 : i32, i32
  }
  func.func @transform_2(%arg0: i32, %arg1: i32) -> (i32, i32) {
    %c0_i32 = arith.constant 0 : i32
    %c0_i32_0 = arith.constant 0 : i32
    %c0_i32_1 = arith.constant 0 : i32
    return %c0_i32, %c0_i32_0 : i32, i32
  }
  func.func @transform_3(%arg0: i32, %arg1: i32) -> (i32, i32) {
    %c0_i32 = arith.constant 0 : i32
    %c0_i32_0 = arith.constant 0 : i32
    return %c0_i32, %arg1 : i32, i32
  }
  func.func @transform_4(%arg0: i32, %arg1: i32) -> (i32, i32) {
    %c0_i32 = arith.constant 0 : i32
    return %arg0, %arg1 : i32, i32
  }
}

</mosaic_0001>

<bundles_post_ra>
// kernel: tpu_custom_call.1
= control target key start
LH: loop header
LB: loop body
LE: loop exit
PB: predicated region body
PF: predicated region fallthrough
CT: control target
= control target key end

     0   :  { %vm52_vm0 = vcmask 64512   ;;  %vm150_vm1 = vcmask 130048   ;;  %s246_s3 = inlined_call_operand.vmem [shape: f32[8,16], index: 3, kind: input, shape index: {}]   ;;  %s247_s0 = inlined_call_operand.vmem [shape: f32[32,8], index: 0, kind: input, shape index: {}]   ;;  %s248_s1 = inlined_call_operand.vmem [shape: f32[1,8], index: 1, kind: input, shape index: {}]   ;;  %s249_s2 = inlined_call_operand.vmem [shape: f32[1,8], index: 2, kind: input, shape index: {}]   ;;  %s250_s4 = inlined_call_operand.vmem [shape: f32[32,16], index: 4, kind: output, shape index: {}]  }
   0x1   :  { %v51_v0 = vld [vmem:[%s246_s3] sm:$0xff]  ;;  %v19_v4 = vld [vmem:[%s247_s0 + $0x10] sm:$0xff]  ;;  %v18_v5 = vld [vmem:[%s247_s0 + $0x8] sm:$0xff] }
   0x2   :  { %v17_v1 = vld [vmem:[%s247_s0] sm:$0xff]  ;;  %170 = vmatprep.subr.mxu0 %v51_v0  ;;  %178 = vmatprep.subr.mxu1 %v51_v0  ;;  %v20_v8 = vld [vmem:[%s247_s0 + $0x18] sm:$0xff] }
   0x3   :  { %v159_v2 = vld [vmem:[%s248_s1] ss:$0 sm:$0xff]  ;;  %171 = vmatpush3.msra.mxu0 %v51_v0  ;;  %179 = vmatpush3.msra.mxu1 %v51_v0 }
   0x4   :  { %v28_v3 = vsub.f32 %v17_v1, %v159_v2  ;;  %v30_v6 = vsub.f32 %v19_v4, %v159_v2  ;;  %v29_v7 = vsub.f32 %v18_v5, %v159_v2  ;;  %v31_v10 = vsub.f32 %v20_v8, %v159_v2  ;;  %v160_v14 = vld [vmem:[%s249_s2] ss:$0 sm:$0xff] }
   0x6   :  { %v32_v9 = vmul.f32 1.442695, %v28_v3  ;;  %v36_v11 = vmul.f32 1.442695, %v30_v6  ;;  %v34_v12 = vmul.f32 1.442695, %v29_v7 }
   0x7   :  { %v38_v13 = vmul.f32 1.442695, %v31_v10 }
   0x8   :  { %180 = vpow2.f32 %v32_v9 }
   0x9   :  { %182 = vpow2.f32 %v36_v11 }
   0xa   :  { %184 = vpow2.f32 %v34_v12 }
   0xb   :  { %186 = vpow2.f32 %v38_v13 }
  0x12   :  { %v181_v15 = vpop.eup %180 }
  0x13   :  { %v183_v16 = vpop.eup %182  ;;  %v47_v17 = vmul.f32 %v181_v15, %v160_v14 }
  0x14   :  { %v185_v18 = vpop.eup %184  ;;  %v49_v19 = vmul.f32 %v183_v16, %v160_v14 }
  0x15   :  { %v187_v20 = vpop.eup %186  ;;  %172 = vmatprep.mubr.msk.f32.mxu0 %vm52_vm0, %v47_v17  ;;  %v48_v21 = vmul.f32 %v185_v18, %v160_v14 }
  0x16   :  { %175 = vmatprep.mubr.msk.f32.mxu1 %vm52_vm0, %v49_v19  ;;  %v50_v22 = vmul.f32 %v187_v20, %v160_v14 }
  0x17   :  { %173 = vmatmul.mubr.msk.f32.vlgmr.msra.gmra.mrb[0].mxu0 %vm52_vm0, %v48_v21 }
  0x18   :  { %176 = vmatmul.mubr.msk.f32.vlgmr.msra.gmra.mrb[0].mxu1 %vm52_vm0, %v50_v22 }
  0xea   :  { %v174_v23 = vpop.f32.mrb[0].mxu0 }
  0xeb   :  { %152 = vst.msk [vmem:[%s250_s4 + $0x8] sm:$0xff] %vm150_vm1, %v174_v23  ;;  %v177_v24 = vpop.f32.mrb[0].mxu1  ;;  %v131_v25 = vpop.f32.mrb[1].mxu0 }
  0xec   :  { %154 = vst.msk [vmem:[%s250_s4 + $0x18] sm:$0xff] %vm150_vm1, %v177_v24  ;;  %151 = vst.msk [vmem:[%s250_s4] sm:$0xff] %vm150_vm1, %v131_v25  ;;  %v141_v26 = vpop.f32.mrb[1].mxu1 }
  0xed   :  { %153 = vst.msk [vmem:[%s250_s4 + $0x10] sm:$0xff] %vm150_vm1, %v141_v26 }

</bundles_post_ra>
